<compile_context>
chip_gen: v7x
topology: tpu7x:2x2x1
jax: 0.10.0
libtpu: 0.0.40
codegen_flags: <defaults>
</compile_context>

<pallas_src>
import functools

import jax
import jax.numpy as jnp
from jax.experimental import pallas as pl
from jax.experimental.pallas import tpu as pltpu


def _round_up(x, m):
    return ((x + m - 1) // m) * m


# ---------------------------------------------------------------------------
# Fused whole-MLP kernel (weights resident in VMEM, activations never hit HBM)
# ---------------------------------------------------------------------------
def _fused_mlp_kernel(*refs, n_layers, compute_dtype):
    # refs = (x_ref, w0, b0, w1, b1, ..., w_{L-1}, b_{L-1}, o_ref)
    x_ref = refs[0]
    o_ref = refs[-1]
    wb_refs = refs[1:-1]

    h = x_ref[...]  # (tile_m, K0) in compute_dtype
    for li in range(n_layers):
        w = wb_refs[2 * li][...]        # (K_i, N_i) compute_dtype
        b = wb_refs[2 * li + 1][...]    # (1, N_i)   float32
        y = jnp.dot(h.astype(w.dtype), w, preferred_element_type=jnp.float32)
        y = y + b                        # f32 epilogue (bias broadcast)
        if li < n_layers - 1:
            y = jnp.maximum(y, 0.0)      # ReLU in f32
            h = y.astype(compute_dtype)  # narrow for the next MXU matmul
        else:
            h = y
    o_ref[...] = h.astype(o_ref.dtype)


def fused_mlp_pallas(x, params, *, compute_dtype=None, tile_m=None):
    """Run the whole MLP in a single pallas_call (grid over batch tiles)."""
    M, K0 = x.shape
    compute_dtype = compute_dtype or x.dtype
    n_layers = len(params)
    n_out = params[-1][0].shape[1]

    if tile_m is None:
        tile_m = min(256, _round_up(M, 8))
    m_pad = _round_up(M, tile_m)

    xc = x.astype(compute_dtype)
    if m_pad != M:
        xc = jnp.pad(xc, ((0, m_pad - M), (0, 0)))

    flat_inputs = [xc]
    in_specs = [pl.BlockSpec((tile_m, K0), lambda i: (i, 0))]
    flops = 0
    bytes_accessed = xc.size * xc.dtype.itemsize
    for (w, b) in params:
        wc = w.astype(compute_dtype)
        b2 = b.astype(jnp.float32).reshape(1, -1)
        flat_inputs += [wc, b2]
        # Constant index_map -> weight/bias resident in VMEM for the whole grid
        # (the pipeline only re-copies when the block index changes).
        in_specs += [
            pl.BlockSpec(wc.shape, lambda i: (0, 0)),
            pl.BlockSpec(b2.shape, lambda i: (0, 0)),
        ]
        flops += 2 * m_pad * w.shape[0] * w.shape[1]
        bytes_accessed += wc.size * wc.dtype.itemsize + b2.size * 4
    bytes_accessed += m_pad * n_out * jnp.dtype(x.dtype).itemsize

    kernel = functools.partial(
        _fused_mlp_kernel, n_layers=n_layers, compute_dtype=compute_dtype
    )

    out = pl.pallas_call(
        kernel,
        out_shape=jax.ShapeDtypeStruct((m_pad, n_out), x.dtype),
        grid=(m_pad // tile_m,),
        in_specs=in_specs,
        out_specs=pl.BlockSpec((tile_m, n_out), lambda i: (i, 0)),
        compiler_params=pltpu.CompilerParams(
            dimension_semantics=("parallel",),        # batch tiles shard across TCs
            vmem_limit_bytes=64 * 1024 * 1024,
        ),
        cost_estimate=pl.CostEstimate(
            flops=flops, transcendentals=0, bytes_accessed=bytes_accessed
        ),
    )(*flat_inputs)

    if m_pad != M:
        out = out[:M]
    return out


# ---------------------------------------------------------------------------
# Per-layer tiled linear (fallback when weights do not fit the VMEM budget)
# ---------------------------------------------------------------------------
def _linear_tiled_kernel(x_ref, w_ref, b_ref, o_ref, acc_ref, *, apply_relu):
    @pl.when(pl.program_id(2) == 0)
    def _init():
        acc_ref[...] = jnp.zeros_like(acc_ref)

    acc_ref[...] += jnp.dot(
        x_ref[...], w_ref[...], preferred_element_type=jnp.float32
    )

    @pl.when(pl.program_id(2) == pl.num_programs(2) - 1)
    def _finalize():
        y = acc_ref[...] + b_ref[...]      # f32 bias
        if apply_relu:
            y = jnp.maximum(y, 0.0)        # f32 ReLU epilogue
        o_ref[...] = y.astype(o_ref.dtype)


def linear_tiled_pallas(x, w, b, *, apply_relu, out_dtype=None, compute_dtype=None,
                        tile_m=256, tile_n=256, tile_k=512):
    """y = x @ w + b (optionally ReLU'd) with M/N/K tiling + f32 accumulator."""
    M, K = x.shape
    K2, N = w.shape
    assert K == K2 and b.shape == (N,)
    out_dtype = out_dtype or x.dtype
    compute_dtype = compute_dtype or x.dtype

    tm = min(tile_m, _round_up(M, 8))
    tn = min(tile_n, _round_up(N, 128))
    tk = min(tile_k, _round_up(K, 128))
    m_pad, k_pad, n_pad = _round_up(M, tm), _round_up(K, tk), _round_up(N, tn)

    xc = x.astype(compute_dtype)
    wc = w.astype(compute_dtype)
    if (m_pad, k_pad) != (M, K):
        xc = jnp.pad(xc, ((0, m_pad - M), (0, k_pad - K)))
    if (k_pad, n_pad) != (K, N):
        wc = jnp.pad(wc, ((0, k_pad - K), (0, n_pad - N)))
    b2 = b.astype(jnp.float32)
    if n_pad != N:
        b2 = jnp.pad(b2, (0, n_pad - N))
    b2 = b2.reshape(1, n_pad)

    grid = (m_pad // tm, n_pad // tn, k_pad // tk)
    kernel = functools.partial(_linear_tiled_kernel, apply_relu=apply_relu)

    out = pl.pallas_call(
        kernel,
        out_shape=jax.ShapeDtypeStruct((m_pad, n_pad), out_dtype),
        grid=grid,
        in_specs=[
            pl.BlockSpec((tm, tk), lambda i, j, k: (i, k)),   # x tile
            pl.BlockSpec((tk, tn), lambda i, j, k: (k, j)),   # w tile
            pl.BlockSpec((1, tn), lambda i, j, k: (0, j)),    # bias tile
        ],
        out_specs=pl.BlockSpec((tm, tn), lambda i, j, k: (i, j)),
        scratch_shapes=[pltpu.VMEM((tm, tn), jnp.float32)],
        compiler_params=pltpu.CompilerParams(
            dimension_semantics=("parallel", "parallel", "arbitrary"),
            vmem_limit_bytes=64 * 1024 * 1024,
        ),
        cost_estimate=pl.CostEstimate(
            flops=2 * m_pad * k_pad * n_pad,
            transcendentals=0,
            bytes_accessed=(xc.size * xc.dtype.itemsize
                            + wc.size * wc.dtype.itemsize
                            + b2.size * 4
                            + m_pad * n_pad * jnp.dtype(out_dtype).itemsize),
        ),
    )(xc, wc, b2)

    if (m_pad, n_pad) != (M, N):
        out = out[:M, :N]
    return out


# ---------------------------------------------------------------------------
# Forward pass dispatch
# ---------------------------------------------------------------------------
def _fused_vmem_estimate(x, params, compute_dtype, tile_m):
    """Conservative resident-VMEM estimate for the fused path (double-buffered)."""
    itemsize = jnp.dtype(compute_dtype).itemsize
    total = 0
    for (w, b) in params:
        total += 2 * (w.size * itemsize + b.size * 4)
    k0 = x.shape[1]
    n_out = params[-1][0].shape[1]
    widths = [k0] + [w.shape[1] for (w, _) in params]
    total += 2 * tile_m * k0 * itemsize
    total += 2 * tile_m * n_out * jnp.dtype(x.dtype).itemsize
    total += 2 * tile_m * max(widths) * 4  # headroom for intermediate activations
    return total


def mlp_forward(x, params, *, compute_dtype=jnp.float32,
                fused_vmem_budget=32 * 1024 * 1024):
    """Hidden layers: Linear -> ReLU; output layer: Linear only."""
    M = x.shape[0]
    tile_m = min(256, _round_up(M, 8))
    if _fused_vmem_estimate(x, params, compute_dtype, tile_m) <= fused_vmem_budget:
        return fused_mlp_pallas(x, params, compute_dtype=compute_dtype, tile_m=tile_m)
    # TODO(synk): for very large models, stream per-layer weight tiles inside a
    # single fused kernel (pltpu.emit_pipeline) instead of per-layer calls.
    h = x
    out_dtype = x.dtype
    for ii, (w, b) in enumerate(params):
        is_output = ii == len(params) - 1
        h = linear_tiled_pallas(h, w, b, apply_relu=not is_output,
                                out_dtype=out_dtype, compute_dtype=compute_dtype)
    return h


# ---------------------------------------------------------------------------
# Init + reference
# ---------------------------------------------------------------------------
def init_mlp_params(dims, key):
    """PyTorch-Linear-style init: U(-1/sqrt(fan_in), +1/sqrt(fan_in))."""
    params = []
    for ii in range(len(dims) - 1):
        fan_in, fan_out = dims[ii], dims[ii + 1]
        key, kw, kb = jax.random.split(key, 3)
        bound = 1.0 / jnp.sqrt(float(fan_in))
        w = jax.random.uniform(kw, (fan_in, fan_out), jnp.float32, -bound, bound)
        b = jax.random.uniform(kb, (fan_out,), jnp.float32, -bound, bound)
        params.append((w, b))
    return params


def mlp_reference(x, params, compute_dtype=None):
    """Pure-JAX reference with the same dtype handling as the kernel."""
    compute_dtype = compute_dtype or x.dtype
    h = x.astype(compute_dtype)
    for ii, (w, b) in enumerate(params):
        y = jnp.dot(h, w.astype(compute_dtype), preferred_element_type=jnp.float32)
        y = y + b.astype(jnp.float32)
        if ii != len(params) - 1:
            y = jnp.maximum(y, 0.0)
            h = y.astype(compute_dtype)
        else:
            h = y
    return h.astype(x.dtype)


if __name__ == "__main__":
    # dims[0]: input dim, dims[1:-1]: hidden dims, dims[-1]: out dim (len >= 3)
    dims = [32, 64, 48, 16]
    batch = 8

    key = jax.random.PRNGKey(0)
    key, kx = jax.random.split(key)
    x = jax.random.normal(kx, (batch, dims[0]), jnp.float32)
    params = init_mlp_params(dims, key)

    # 1) Fused whole-MLP kernel, f32 operands.
    out = jax.block_until_ready(mlp_forward(x, params, compute_dtype=jnp.float32))
    ref = mlp_reference(x, params)
    assert out.shape == (batch, dims[-1])
    assert jnp.allclose(out, ref, atol=1e-5, rtol=1e-5)

    # 2) Fused kernel with bf16 operands (MXU fast path on v6e/v7x), f32 accumulation.
    out_bf = jax.block_until_ready(mlp_forward(x, params, compute_dtype=jnp.bfloat16))
    ref_bf = mlp_reference(x, params, compute_dtype=jnp.bfloat16)
    assert jnp.allclose(out_bf, ref_bf, atol=1e-2, rtol=1e-2)

    # 3) Exercise the M/N/K-tiled fallback kernel on a ragged, multi-tile shape.
    key, k1, k2, k3 = jax.random.split(key, 4)
    xl = jax.random.normal(k1, (200, 300), jnp.float32)
    wl = jax.random.normal(k2, (300, 200), jnp.float32) * 0.05
    bl = jax.random.normal(k3, (200,), jnp.float32)
    yl = jax.block_until_ready(
        linear_tiled_pallas(xl, wl, bl, apply_relu=True,
                            tile_m=128, tile_n=128, tile_k=128))
    yl_ref = jnp.maximum(xl @ wl + bl, 0.0)
    assert jnp.allclose(yl, yl_ref, atol=1e-4, rtol=1e-4)

    print("KERNEL_OK")
</pallas_src>

<mosaic_0001>
module attributes {stable_mosaic.version = 11 : i64} {
  func.func @_fused_mlp_kernel(%arg0: i32, %arg1: memref<8x32xf32, #tpu.memory_space<vmem>>, %arg2: memref<32x64xf32, #tpu.memory_space<vmem>>, %arg3: memref<1x64xf32, #tpu.memory_space<vmem>>, %arg4: memref<64x48xf32, #tpu.memory_space<vmem>>, %arg5: memref<1x48xf32, #tpu.memory_space<vmem>>, %arg6: memref<48x16xf32, #tpu.memory_space<vmem>>, %arg7: memref<1x16xf32, #tpu.memory_space<vmem>>, %arg8: memref<8x16xf32, #tpu.memory_space<vmem>>) attributes {dimension_semantics = [#tpu.dimension_semantics<parallel>], iteration_bounds = array<i64: 1>, scalar_prefetch = 0 : i64, scratch_operands = 0 : i64, tpu.core_type = #tpu.core_type<tc>, window_params = [{transform_indices = @transform_0, window_bounds = array<i64: 8, 32>}, {pipeline_mode = #tpu.pipeline_mode<synchronous>, transform_indices = @transform_1, window_bounds = array<i64: 32, 64>}, {pipeline_mode = #tpu.pipeline_mode<synchronous>, transform_indices = @transform_2, window_bounds = array<i64: 1, 64>}, {pipeline_mode = #tpu.pipeline_mode<synchronous>, transform_indices = @transform_3, window_bounds = array<i64: 64, 48>}, {pipeline_mode = #tpu.pipeline_mode<synchronous>, transform_indices = @transform_4, window_bounds = array<i64: 1, 48>}, {pipeline_mode = #tpu.pipeline_mode<synchronous>, transform_indices = @transform_5, window_bounds = array<i64: 48, 16>}, {pipeline_mode = #tpu.pipeline_mode<synchronous>, transform_indices = @transform_6, window_bounds = array<i64: 1, 16>}, {transform_indices = @transform_7, window_bounds = array<i64: 8, 16>}]} {
    %c0 = arith.constant 0 : index
    %c0_0 = arith.constant 0 : index
    %0 = vector.load %arg1[%c0, %c0_0] : memref<8x32xf32, #tpu.memory_space<vmem>>, vector<8x32xf32>
    %c0_1 = arith.constant 0 : index
    %c0_2 = arith.constant 0 : index
    %1 = vector.load %arg2[%c0_1, %c0_2] : memref<32x64xf32, #tpu.memory_space<vmem>>, vector<32x64xf32>
    %c0_3 = arith.constant 0 : index
    %c0_4 = arith.constant 0 : index
    %2 = vector.load %arg3[%c0_3, %c0_4] : memref<1x64xf32, #tpu.memory_space<vmem>>, vector<1x64xf32>
    %cst = arith.constant dense<0.000000e+00> : vector<8x64xf32>
    %3 = tpu.matmul %0, %1, %cst {dimension_numbers = #tpu.dot_dimension_numbers<[1], [0], [0], [1], [0, 0, 1, 1], [], []>} : vector<8x32xf32>, vector<32x64xf32>, vector<8x64xf32> -> vector<8x64xf32>
    %4 = vector.broadcast %2 : vector<1x64xf32> to vector<8x64xf32>
    %5 = arith.addf %3, %4 : vector<8x64xf32>
    %cst_5 = arith.constant 0.000000e+00 : f32
    %6 = vector.broadcast %cst_5 : f32 to vector<8x64xf32>
    %7 = arith.maximumf %5, %6 : vector<8x64xf32>
    %c0_6 = arith.constant 0 : index
    %c0_7 = arith.constant 0 : index
    %8 = vector.load %arg4[%c0_6, %c0_7] : memref<64x48xf32, #tpu.memory_space<vmem>>, vector<64x48xf32>
    %c0_8 = arith.constant 0 : index
    %c0_9 = arith.constant 0 : index
    %9 = vector.load %arg5[%c0_8, %c0_9] : memref<1x48xf32, #tpu.memory_space<vmem>>, vector<1x48xf32>
    %cst_10 = arith.constant dense<0.000000e+00> : vector<8x48xf32>
    %10 = tpu.matmul %7, %8, %cst_10 {dimension_numbers = #tpu.dot_dimension_numbers<[1], [0], [0], [1], [0, 0, 1, 1], [], []>} : vector<8x64xf32>, vector<64x48xf32>, vector<8x48xf32> -> vector<8x48xf32>
    %11 = vector.broadcast %9 : vector<1x48xf32> to vector<8x48xf32>
    %12 = arith.addf %10, %11 : vector<8x48xf32>
    %cst_11 = arith.constant 0.000000e+00 : f32
    %13 = vector.broadcast %cst_11 : f32 to vector<8x48xf32>
    %14 = arith.maximumf %12, %13 : vector<8x48xf32>
    %c0_12 = arith.constant 0 : index
    %c0_13 = arith.constant 0 : index
    %15 = vector.load %arg6[%c0_12, %c0_13] : memref<48x16xf32, #tpu.memory_space<vmem>>, vector<48x16xf32>
    %c0_14 = arith.constant 0 : index
    %c0_15 = arith.constant 0 : index
    %16 = vector.load %arg7[%c0_14, %c0_15] : memref<1x16xf32, #tpu.memory_space<vmem>>, vector<1x16xf32>
    %cst_16 = arith.constant dense<0.000000e+00> : vector<8x16xf32>
    %17 = tpu.matmul %14, %15, %cst_16 {dimension_numbers = #tpu.dot_dimension_numbers<[1], [0], [0], [1], [0, 0, 1, 1], [], []>} : vector<8x48xf32>, vector<48x16xf32>, vector<8x16xf32> -> vector<8x16xf32>
    %18 = vector.broadcast %16 : vector<1x16xf32> to vector<8x16xf32>
    %19 = arith.addf %17, %18 : vector<8x16xf32>
    %c0_17 = arith.constant 0 : index
    %c0_18 = arith.constant 0 : index
    %20 = vector.load %arg8[%c0_17, %c0_18] : memref<8x16xf32, #tpu.memory_space<vmem>>, vector<8x16xf32>
    tpu.vector_store %arg8[%c0_17, %c0_18], %19 {strides = array<i32>} : memref<8x16xf32, #tpu.memory_space<vmem>>, vector<8x16xf32>,
    return
  }
  func.func @transform_0(%arg0: i32) -> (i32, i32) {
    %c0_i32 = arith.constant 0 : i32
    %c0_i32_0 = arith.constant 0 : i32
    return %arg0, %c0_i32 : i32, i32
  }
  func.func @transform_1(%arg0: i32) -> (i32, i32) {
    %c0_i32 = arith.constant 0 : i32
    %c0_i32_0 = arith.constant 0 : i32
    %c0_i32_1 = arith.constant 0 : i32
    return %c0_i32, %c0_i32_0 : i32, i32
  }
  func.func @transform_2(%arg0: i32) -> (i32, i32) {
    %c0_i32 = arith.constant 0 : i32
    %c0_i32_0 = arith.constant 0 : i32
    %c0_i32_1 = arith.constant 0 : i32
    return %c0_i32, %c0_i32_0 : i32, i32
  }
  func.func @transform_3(%arg0: i32) -> (i32, i32) {
    %c0_i32 = arith.constant 0 : i32
    %c0_i32_0 = arith.constant 0 : i32
    %c0_i32_1 = arith.constant 0 : i32
    return %c0_i32, %c0_i32_0 : i32, i32
  }
  func.func @transform_4(%arg0: i32) -> (i32, i32) {
    %c0_i32 = arith.constant 0 : i32
    %c0_i32_0 = arith.constant 0 : i32
    %c0_i32_1 = arith.constant 0 : i32
    return %c0_i32, %c0_i32_0 : i32, i32
  }
  func.func @transform_5(%arg0: i32) -> (i32, i32) {
    %c0_i32 = arith.constant 0 : i32
    %c0_i32_0 = arith.constant 0 : i32
    %c0_i32_1 = arith.constant 0 : i32
    return %c0_i32, %c0_i32_0 : i32, i32
  }
  func.func @transform_6(%arg0: i32) -> (i32, i32) {
    %c0_i32 = arith.constant 0 : i32
    %c0_i32_0 = arith.constant 0 : i32
    %c0_i32_1 = arith.constant 0 : i32
    return %c0_i32, %c0_i32_0 : i32, i32
  }
  func.func @transform_7(%arg0: i32) -> (i32, i32) {
    %c0_i32 = arith.constant 0 : i32
    %c0_i32_0 = arith.constant 0 : i32
    return %arg0, %c0_i32 : i32, i32
  }
}

</mosaic_0001>

<bundles_post_ra>
// kernel: tpu_custom_call.1
= control target key start
LH: loop header
LB: loop body
LE: loop exit
PB: predicated region body
PF: predicated region fallthrough
CT: control target
= control target key end

     0   :  { %12 = vsyncpa [#allocation3], 0  ;;  %s857_s0 = inlined_call_operand.hbm [shape: f32[8,32], index: 0, kind: input, shape index: {}]   ;;  %s858_s1 = inlined_call_operand.hbm [shape: f32[32,64], index: 1, kind: input, shape index: {}]   ;;  %s859_s2 = inlined_call_operand.hbm [shape: f32[1,64], index: 2, kind: input, shape index: {}]   ;;  %s860_s3 = inlined_call_operand.hbm [shape: f32[64,48], index: 3, kind: input, shape index: {}]   ;;  %s861_s4 = inlined_call_operand.hbm [shape: f32[1,48], index: 4, kind: input, shape index: {}]   ;;  %s862_s5 = inlined_call_operand.hbm [shape: f32[48,16], index: 5, kind: input, shape index: {}]   ;;  %s863_s6 = inlined_call_operand.hbm [shape: f32[1,16], index: 6, kind: input, shape index: {}]   ;;  %s864_s7 = inlined_call_operand.hbm [shape: f32[8,16], index: 7, kind: output, shape index: {}]  }
   0x1   :  { %13 = vsyncpa [#allocation6], 0 }
   0x2   :  { %14 = vsyncpa [#allocation9], 0 }
   0x3   :  { %15 = vsyncpa [#allocation12], 0 }
   0x4   :  { %16 = vsyncpa [#allocation4], 0  ;;  %s696_s24 = smov [#allocation5]   ;;  %s510_s28 = scalar_lea.hbm %s858_s1, 512 }
   0x5   :  { %s32_s25 = sshll.u32 %s696_s24, 4  ;;  %p511_p0 = scmp.ne.s32.totalorder %s858_s1, %s510_s28  ;;  %s33_s25 = int_to_ptr.vmem [resolvable:$true] %s32_s25 }
   0x6   :  { %p514_p1 = scmp.lt.u32.totalorder %s510_s28, %s858_s1 }
   0x8   :  { %p516_p2 = pnand %p514_p1, %p511_p0 }
   0xa   :  { %519 = shalt.err (!%p516_p2)
}
   0xb   :  { %s520_s10 = scalar_lea.vmem %s33_s25, 512  ;;  %p525_p4 = scmp.lt.s32.totalorder %s33_s25, %s33_s25 }
   0xc   :  { %p521_p3 = scmp.ne.s32.totalorder %s33_s25, %s520_s10  ;;  %p526_p5 = scmp.lt.s32.totalorder %s520_s10, %s520_s10 }
   0xe   :  { %p527_p6 = por %p526_p5, %p525_p4 }
  0x10   :  { %p528_p7 = pnand %p527_p6, %p521_p3 }
  0x12   :  { %531 = shalt.err (!%p528_p7)
}
  0x13   :  { %s697_s11 = smov 128   ;;  %s698_s12 = smov 8  }
  0x14   :  { %38 = dma.hbm_to_vmem [thread:$0]  %s858_s1, 512, %s33_s25, [#allocation6], %s697_s11, %s697_s11, %s698_s12  }
  0x15   :  { %s699_s15 = smov [#allocation8]   ;;  %s700_s17 = smov [#allocation11]  }
  0x16   :  { %s54_s16 = sshll.u32 %s699_s15, 4  ;;  %s76_s18 = sshll.u32 %s700_s17, 4  ;;  %s55_s16 = int_to_ptr.vmem [resolvable:$true] %s54_s16  ;;  %s77_s18 = int_to_ptr.vmem [resolvable:$true] %s76_s18 }
  0x17   :  { %s532_s21 = scalar_lea.hbm %s860_s3, 1024 }
  0x18   :  { %p533_p8 = scmp.ne.s32.totalorder %s860_s3, %s532_s21  ;;  %p536_p9 = scmp.lt.u32.totalorder %s532_s21, %s860_s3 }
  0x1a   :  { %p538_p10 = pnand %p536_p9, %p533_p8 }
  0x1c   :  { %541 = shalt.err (!%p538_p10)
}
  0x1d   :  { %s542_s1 = scalar_lea.vmem %s55_s16, 1024  ;;  %p547_p12 = scmp.lt.s32.totalorder %s55_s16, %s55_s16 }
  0x1e   :  { %p543_p11 = scmp.ne.s32.totalorder %s55_s16, %s542_s1  ;;  %p548_p13 = scmp.lt.s32.totalorder %s542_s1, %s542_s1 }
  0x20   :  { %p549_p0 = por %p548_p13, %p547_p12 }
  0x22   :  { %p550_p1 = pnand %p549_p0, %p543_p11 }
  0x24   :  { %553 = shalt.err (!%p550_p1)
}
  0x25   :  { %60 = dma.hbm_to_vmem [thread:$0]  %s860_s3, 1024, %s55_s16, [#allocation9], %s697_s11, %s697_s11, %s698_s12  }
  0x26   :  { %s554_s30 = scalar_lea.hbm %s862_s5, 768 }
  0x27   :  { %p555_p2 = scmp.ne.s32.totalorder %s862_s5, %s554_s30  ;;  %p558_p3 = scmp.lt.u32.totalorder %s554_s30, %s862_s5 }
  0x29   :  { %p560_p4 = pnand %p558_p3, %p555_p2 }
  0x2b   :  { %563 = shalt.err (!%p560_p4)
}
  0x2c   :  { %s564_s14 = scalar_lea.vmem %s77_s18, 768  ;;  %p569_p6 = scmp.lt.s32.totalorder %s77_s18, %s77_s18 }
  0x2d   :  { %p565_p5 = scmp.ne.s32.totalorder %s77_s18, %s564_s14  ;;  %p570_p7 = scmp.lt.s32.totalorder %s564_s14, %s564_s14 }
  0x2f   :  { %p571_p8 = por %p570_p7, %p569_p6 }
  0x31   :  { %p572_p9 = pnand %p571_p8, %p565_p5 }
  0x33   :  { %575 = shalt.err (!%p572_p9)
}
  0x34   :  { %82 = dma.hbm_to_vmem [thread:$0]  %s862_s5, 768, %s77_s18, [#allocation12], %s697_s11, %s697_s11, %s698_s12  }
  0x35   :  { %s701_s16 = smov [#allocation2]   ;;  %s702_s19 = smov [#allocation7]  }
  0x36   :  { %s23_s17 = sshll.u32 %s701_s16, 4  ;;  %s45_s20 = sshll.u32 %s702_s19, 4  ;;  %s24_s17 = int_to_ptr.vmem [resolvable:$true] %s23_s17  ;;  %s46_s20 = int_to_ptr.vmem [resolvable:$true] %s45_s20 }
  0x37   :  { %s576_s23 = scalar_lea.hbm %s857_s0, 128 }
  0x38   :  { %p577_p10 = scmp.ne.s32.totalorder %s857_s0, %s576_s23  ;;  %p580_p11 = scmp.lt.u32.totalorder %s576_s23, %s857_s0 }
  0x3a   :  { %p582_p12 = pnand %p580_p11, %p577_p10 }
  0x3c   :  { %585 = shalt.err (!%p582_p12)
}
  0x3d   :  { %s586_s5 = scalar_lea.vmem %s24_s17, 128  ;;  %p591_p0 = scmp.lt.s32.totalorder %s24_s17, %s24_s17 }
  0x3e   :  { %p587_p13 = scmp.ne.s32.totalorder %s24_s17, %s586_s5  ;;  %p592_p1 = scmp.lt.s32.totalorder %s586_s5, %s586_s5 }
  0x40   :  { %p593_p2 = por %p592_p1, %p591_p0 }
  0x42   :  { %p594_p3 = pnand %p593_p2, %p587_p13 }
  0x44   :  { %597 = shalt.err (!%p594_p3)
}
  0x45   :  { %26 = dma.hbm_to_vmem [thread:$0]  %s857_s0, 128, %s24_s17, [#allocation3]  }
  0x46   :  { %s598_s28 = scalar_lea.hbm %s859_s2, 16 }
  0x47   :  { %p599_p4 = scmp.ne.s32.totalorder %s859_s2, %s598_s28  ;;  %p602_p5 = scmp.lt.u32.totalorder %s598_s28, %s859_s2 }
  0x49   :  { %p604_p6 = pnand %p602_p5, %p599_p4 }
  0x4b   :  { %607 = shalt.err (!%p604_p6)
}
  0x4c   :  { %s608_s10 = scalar_lea.vmem %s46_s20, 16  ;;  %s612_s13 = scalar_lea.vmem %s46_s20, 32 }
  0x4d   :  { %p609_p7 = scmp.ne.s32.totalorder %s46_s20, %s608_s10  ;;  %p613_p8 = scmp.lt.s32.totalorder %s46_s20, %s46_s20 }
  0x4e   :  { %p614_p9 = scmp.lt.s32.totalorder %s612_s13, %s608_s10 }
  0x50   :  { %p615_p10 = por %p614_p9, %p613_p8 }
  0x52   :  { %p616_p11 = pnand %p615_p10, %p609_p7 }
  0x54   :  { %619 = shalt.err (!%p616_p11)
}
  0x55   :  { %48 = dma.hbm_to_vmem [thread:$0]  %s859_s2, 16, %s46_s20, [#allocation6]  }
  0x56   :  { %s703_s3 = smov [#allocation10]   ;;  %s704_s16 = smov [#allocation13]  }
  0x57   :  { %s67_s15 = sshll.u32 %s703_s3, 4  ;;  %s89_s17 = sshll.u32 %s704_s16, 4  ;;  %s68_s15 = int_to_ptr.vmem [resolvable:$true] %s67_s15  ;;  %s90_s17 = int_to_ptr.vmem [resolvable:$true] %s89_s17 }
  0x58   :  { %s620_s22 = scalar_lea.hbm %s861_s4, 16 }
  0x59   :  { %p621_p12 = scmp.ne.s32.totalorder %s861_s4, %s620_s22  ;;  %p624_p13 = scmp.lt.u32.totalorder %s620_s22, %s861_s4 }
  0x5b   :  { %p626_p0 = pnand %p624_p13, %p621_p12 }
  0x5d   :  { %629 = shalt.err (!%p626_p0)
}
  0x5e   :  { %s630_s2 = scalar_lea.vmem %s68_s15, 16  ;;  %s634_s20 = scalar_lea.vmem %s68_s15, 32 }
  0x5f   :  { %p631_p1 = scmp.ne.s32.totalorder %s68_s15, %s630_s2  ;;  %p635_p2 = scmp.lt.s32.totalorder %s68_s15, %s68_s15 }
  0x60   :  { %p636_p3 = scmp.lt.s32.totalorder %s634_s20, %s630_s2 }
  0x62   :  { %p637_p4 = por %p636_p3, %p635_p2 }
  0x64   :  { %p638_p5 = pnand %p637_p4, %p631_p1 }
  0x66   :  { %641 = shalt.err (!%p638_p5)
}
  0x67   :  { %70 = dma.hbm_to_vmem [thread:$0]  %s861_s4, 16, %s68_s15, [#allocation9]  }
  0x68   :  { %s642_s18 = scalar_lea.hbm %s863_s6, 16 }
  0x69   :  { %p643_p6 = scmp.ne.s32.totalorder %s863_s6, %s642_s18  ;;  %p646_p7 = scmp.lt.u32.totalorder %s642_s18, %s863_s6 }
  0x6b   :  { %p648_p8 = pnand %p646_p7, %p643_p6 }
  0x6d   :  { %651 = shalt.err (!%p648_p8)
}
  0x6e   :  { %s652_s8 = scalar_lea.vmem %s90_s17, 16  ;;  %s656_s9 = scalar_lea.vmem %s90_s17, 32 }
  0x6f   :  { %p653_p9 = scmp.ne.s32.totalorder %s90_s17, %s652_s8  ;;  %p657_p10 = scmp.lt.s32.totalorder %s90_s17, %s90_s17 }
  0x70   :  { %p658_p11 = scmp.lt.s32.totalorder %s656_s9, %s652_s8 }
  0x72   :  { %p659_p12 = por %p658_p11, %p657_p10 }
  0x74   :  { %p660_p13 = pnand %p659_p12, %p653_p9 }
  0x76   :  { %663 = shalt.err (!%p660_p13)
}
  0x77   :  { %92 = dma.hbm_to_vmem [thread:$0]  %s863_s6, 16, %s90_s17, [#allocation12]  }
  0x78   :  { %686 = dma.done.wait [#allocation3], 128  }
  0x79   :  { %687 = vsyncadd [#allocation3], 4294967168 }
  0x7a   :  { %688 = dma.done.wait [#allocation6], 528  }
  0x7b   :  { %689 = vsyncadd [#allocation6], 4294966768 }
  0x7c   :  { %690 = dma.done.wait [#allocation9], 1040  }
  0x7d   :  { %691 = vsyncadd [#allocation9], 4294966256 }
  0x7e   :  { %692 = dma.done.wait [#allocation12], 784  }
  0x7f   :  { %693 = vsyncadd [#allocation12], 4294966512  ;;  %v705_v0 = vmov 0.0|0.0   ;;  %vm706_vm0 = vmmov 0   ;;  %v707_v1 = vmov 0.0   ;;  %v115_v2 = vld [vmem:[#allocation5] sm:$0xff] }
  0x80   :  { %470 = vmatprep.subr.bf16.mxu0 %v705_v0  ;;  %433 = vmatprep.mubr.msk.f32.mxu0 %vm706_vm0, %v707_v1  ;;  %v116_v3 = vld [vmem:[#allocation5 + $0x8] sm:$0xff]  ;;  %v117_v4 = vld [vmem:[#allocation5 + $0x10] sm:$0xff]  ;;  %v118_v6 = vld [vmem:[#allocation5 + $0x18] sm:$0xff]  ;;  %vm126_vm1 = vcmask 261120   ;;  %vm216_vm2 = vcmask 523264   ;;  %vm304_vm3 = vcmask 392192  }
  0x81   :  { %476 = vmatprep.subr.bf16.mxu1 %v705_v0  ;;  %452 = vmatprep.mubr.msk.f32.mxu1 %vm706_vm0, %v707_v1  ;;  %v471_v5 = vpack.c.bf16 %v116_v3, %v115_v2  ;;  %v201_v7 = vld [vmem:[#allocation8] sm:$0xff]  ;;  %v202_v8 = vld [vmem:[#allocation8 + $0x8] sm:$0xff]  ;;  %v203_v9 = vld [vmem:[#allocation8 + $0x10] sm:$0xff]  ;;  %v474_v11 = vpack.c.bf16 %v118_v6, %v117_v4  ;;  %s708_s6 = smov [#allocation14]   ;;  %vm378_vm4 = vcmask 130048  }
  0x82   :  { %v204_v10 = vld [vmem:[#allocation8 + $0x18] sm:$0xff]  ;;  %v477_v12 = vpack.c.bf16 %v202_v8, %v201_v7  ;;  %v205_v14 = vld [vmem:[#allocation8 + $0x20] sm:$0xff]  ;;  %v206_v15 = vld [vmem:[#allocation8 + $0x28] sm:$0xff]  ;;  %s386_s13 = sshll.u32 %s708_s6, 4  ;;  %s387_s13 = int_to_ptr.vmem [resolvable:$true] %s386_s13 }
  0x83   :  { %472 = vmatpush3.bf16.msra.mxu0 %v471_v5  ;;  %v480_v13 = vpack.c.bf16 %v204_v10, %v203_v9  ;;  %v114_v16 = vld [vmem:[#allocation2] sm:$0xff]  ;;  %v483_v17 = vpack.c.bf16 %v206_v15, %v205_v14  ;;  %v291_v21 = vld [vmem:[#allocation11] sm:$0xff]  ;;  %v292_v22 = vld [vmem:[#allocation11 + $0x8] sm:$0xff]  ;;  %s664_s0 = scalar_lea.vmem %s387_s13, 128  ;;  %p669_p1 = scmp.lt.s32.totalorder %s387_s13, %s387_s13 }
  0x84   :  { %473 = vmatprep.subr.bf16.mxu0 %v705_v0  ;;  %478 = vmatpush3.bf16.msra.mxu1 %v477_v12  ;;  %v207_v18 = vld [vmem:[#allocation8 + $0x30] sm:$0xff]  ;;  %v208_v19 = vld [vmem:[#allocation8 + $0x38] sm:$0xff]  ;;  %v489_v24 = vpack.c.bf16 %v292_v22, %v291_v21  ;;  %v295_v32 = vld [vmem:[#allocation11 + $0x20] sm:$0xff]  ;;  %p665_p0 = scmp.ne.s32.totalorder %s387_s13, %s664_s0  ;;  %p670_p2 = scmp.lt.s32.totalorder %s664_s0, %s664_s0 }
  0x85   :  { %479 = vmatprep.subr.bf16.mxu1 %v705_v0  ;;  %v486_v20 = vpack.c.bf16 %v208_v19, %v207_v18  ;;  %v293_v23 = vld [vmem:[#allocation11 + $0x10] sm:$0xff]  ;;  %v294_v25 = vld [vmem:[#allocation11 + $0x18] sm:$0xff]  ;;  %v296_v33 = vld [vmem:[#allocation11 + $0x28] sm:$0xff] }
  0x86   :  { %v492_v26 = vpack.c.bf16 %v294_v25, %v293_v23  ;;  %v398_v27 = vld [vmem:[#allocation7] ss:$0 sm:$0xff]  ;;  %v495_v34 = vpack.c.bf16 %v296_v33, %v295_v32  ;;  %v400_v35 = vld [vmem:[#allocation10] ss:$0 sm:$0xff]  ;;  %v402_v40 = vld [vmem:[#allocation13] ss:$0 sm:$0xff]  ;;  %p671_p3 = por %p670_p2, %p669_p1 }
  0x87   :  { %475 = vmatpush3.bf16.msra.mxu0 %v474_v11 }
  0x88   :  { %488 = vmatprep.subr.bf16.mxu0 %v705_v0  ;;  %481 = vmatpush3.bf16.msra.mxu1 %v480_v13  ;;  %p672_p4 = pnand %p671_p3, %p665_p0 }
  0x89   :  { %482 = vmatprep.subr.bf16.mxu1 %v705_v0 }
  0x8a   :  { %434 = vmatmul.mubr.msk.f32.vlgmr.msra.gmra.mrb[0].mxu0 %vm126_vm1, %v114_v16 }
  0x8b   :  { %467 = vmatprep.mubr.msk.f32.mxu0 %vm706_vm0, %v707_v1  ;;  %490 = vmatpush3.bf16.msra.mxu0 %v489_v24 }
  0x8c   :  { %484 = vmatpush3.bf16.msra.mxu1 %v483_v17  ;;  %491 = vmatprep.subr.bf16.mxu0 %v705_v0 }
  0x8d   :  { %485 = vmatprep.subr.bf16.mxu1 %v705_v0 }
  0x8f   :  { %493 = vmatpush3.bf16.msra.mxu0 %v492_v26 }
  0x90   :  { %487 = vmatpush3.bf16.msra.mxu1 %v486_v20  ;;  %494 = vmatprep.subr.bf16.mxu0 %v705_v0 }
  0x93   :  { %496 = vmatpush3.bf16.msra.mxu0 %v495_v34 }
 0x15d   :  { %v196_v28 = vpop.f32.mrb[0].mxu0 }
 0x15e   :  { %v197_v29 = vadd.f32 %v398_v27, %v196_v28  ;;  %v435_v30 = vpop.f32.mrb[1].mxu0 }
 0x160   :  { %v200_v31 = vmax.f32 %v197_v29, 0.0 }
 0x162   :  { %453 = vmatmul.mubr.msk.f32.vlgmr.msra.gmra.mrb[0].mxu1 %vm216_vm2, %v200_v31 }
 0x235   :  { %v286_v36 = vpop.f32.mrb[0].mxu1 }
 0x236   :  { %v287_v37 = vadd.f32 %v400_v35, %v286_v36  ;;  %v454_v38 = vpop.f32.mrb[1].mxu1 }
 0x238   :  { %v290_v39 = vmax.f32 %v287_v37, 0.0 }
 0x23a   :  { %468 = vmatmul.mubr.msk.f32.vlgmr.msra.gmra.mrb[2].mxu0 %vm304_vm3, %v290_v39 }
 0x30d   :  { %v374_v41 = vpop.f32.mrb[2].mxu0 }
 0x30e   :  { %v375_v42 = vadd.f32 %v402_v40, %v374_v41  ;;  %v469_v43 = vpop.f32.mrb[3].mxu0 }
 0x310   :  { %379 = vst.msk [vmem:[#allocation14] sm:$0xff] %vm378_vm4, %v375_v42 }
 0x311   :  { %675 = shalt.err (!%p672_p4)
}
 0x312   :  { %s676_s15 = scalar_lea.hbm %s864_s7, 128 }
 0x313   :  { %p677_p5 = scmp.ne.s32.totalorder %s864_s7, %s676_s15  ;;  %p680_p6 = scmp.lt.u32.totalorder %s676_s15, %s864_s7 }
 0x315   :  { %p682_p7 = pnand %p680_p6, %p677_p5 }
 0x317   :  { %685 = shalt.err (!%p682_p7)
}
 0x318   :  { %389 = dma.vmem_to_hbm [thread:$0]  %s387_s13, 128, %s864_s7, [#allocation4]  }
 0x319   :  { %694 = dma.done.wait [#allocation4], 128  }
 0x31a   :  { %695 = vsyncadd [#allocation4], 4294967168 }
 0x31b   :  { %393 = vsyncpa [#allocation3], 1 }
 0x31c   :  { %394 = vsyncpa [#allocation6], 1 }
 0x31d   :  { %395 = vsyncpa [#allocation9], 1 }
 0x31e   :  { %396 = vsyncpa [#allocation12], 1 }
 0x31f   :  { %397 = vsyncpa [#allocation4], 1 }

</bundles_post_ra>
